<compile_context>
chip_gen: v7x
topology: tpu7x:2x2x1
jax: 0.10.0
libtpu: 0.0.40
codegen_flags: <defaults>
</compile_context>

<pallas_src>
import math
import functools

import jax
import jax.numpy as jnp
from jax.experimental import pallas as pl
from jax.experimental.pallas import tpu as pltpu


def _vmem_capacity_bytes():
    """Physical per-core VMEM; conservative 64 MiB (v7x) if unknown."""
    try:
        return int(pltpu.get_tpu_info().vmem_capacity_bytes)
    except Exception:
        return 64 * 1024 * 1024


def _vmem_estimate(bt, tl, S, H, E, D, itemsize):
    """Trace-time VMEM estimate for one grid step's resident buffers."""
    qo = 2 * bt * tl * H * (E + D) * itemsize        # q + o tiles, double-buffered
    kv = bt * S * H * (E + D) * itemsize             # K + V blocks, single-buffered
    sc = tl * S * 4 + tl * (D + 2) * 4               # ONE head's f32 scores + acc/stats
    return qo + kv + sc


def _select_tiles(B, L, S, H, E, D, itemsize, budget):
    """Pick (batch_tile, l_tile) so one grid step fits the VMEM budget."""
    tl_cands = [t for t in (512, 256, 128) if L % t == 0] or [L]
    # Sub-128 lane widths / short sequences: per-step work is overhead
    # dominated, so fold several batches into one block.
    small_work = (H * max(E, D) < 128) or (L < 128) or (S < 128)
    bt_cands = ([b for b in (8, 4, 2) if B % b == 0] + [1]) if small_work else [1]

    for tl in tl_cands:                               # prefer the largest L tile
        for bt in bt_cands:                           # then the largest batch tile
            if _vmem_estimate(bt, tl, S, H, E, D, itemsize) <= budget:
                return bt, tl

    # Still too big: shrink the L tile (keep sublane-8 granularity / divisibility).
    tl = tl_cands[-1]
    while (_vmem_estimate(1, tl, S, H, E, D, itemsize) > budget
           and tl % 16 == 0 and tl > 8):
        tl //= 2
    return 1, tl


def _attn_kernel(q_ref, k_ref, v_ref, o_ref, *, scale, num_heads, e_dim, d_dim,
                 batch_tile):
    # q_ref: (bt, TL, H*E)  k_ref: (bt, S, H*E)  v_ref: (bt, S, H*D)
    # o_ref: (bt, TL, H*D)
    for b in range(batch_tile):              # static unroll: independent batches
        for h in range(num_heads):           # static unroll: independent heads
            # Per-head slices straight off the refs (static offsets are folded
            # into the loads); softmax scale folded into q before QK^T.
            q_h = q_ref[b, :, h * e_dim:(h + 1) * e_dim] * scale   # (TL, E)
            k_h = k_ref[b, :, h * e_dim:(h + 1) * e_dim]           # (S, E)
            v_h = v_ref[b, :, h * d_dim:(h + 1) * d_dim]           # (S, D)

            # scores[l, s] = sum_e q[l, e] * k[s, e]
            s_h = jax.lax.dot_general(
                q_h, k_h,
                dimension_numbers=(((1,), (1,)), ((), ())),
                preferred_element_type=jnp.float32,
            )                                                     # (TL, S) f32

            # Numerically stable softmax with DEFERRED normalization.
            m_h = jnp.max(s_h, axis=-1, keepdims=True)
            p_h = jnp.exp(s_h - m_h)                              # unnormalized
            l_h = jnp.sum(p_h, axis=-1, keepdims=True)            # (TL, 1)

            o_h = jnp.dot(p_h.astype(v_h.dtype), v_h,
                          preferred_element_type=jnp.float32)     # (TL, D) f32
            o_h = o_h * pl.reciprocal(l_h, approx=True)           # TL*D mults

            o_ref[b, :, h * d_dim:(h + 1) * d_dim] = o_h.astype(o_ref.dtype)


def _build_call(kernel, B, L, S, H, E, D, dtype, bt, tl, vmem_limit, cost,
                single_buffer_kv):
    kv_kwargs = {}
    if single_buffer_kv:
        # K/V block index is constant across the inner L axis -> no overlap
        # benefit from double buffering; halve the largest VMEM consumer.
        kv_kwargs = dict(pipeline_mode=pl.Buffered(1))
    return pl.pallas_call(
        kernel,
        out_shape=jax.ShapeDtypeStruct((B, L, H * D), dtype),
        grid_spec=pltpu.PrefetchScalarGridSpec(
            num_scalar_prefetch=0,
            grid=(B // bt, L // tl),                 # B leads -> cores shard batches
            in_specs=[
                pl.BlockSpec((bt, tl, H * E), lambda b, l: (b, l, 0)),
                pl.BlockSpec((bt, S, H * E), lambda b, l: (b, 0, 0), **kv_kwargs),
                pl.BlockSpec((bt, S, H * D), lambda b, l: (b, 0, 0), **kv_kwargs),
            ],
            out_specs=pl.BlockSpec((bt, tl, H * D), lambda b, l: (b, l, 0)),
        ),
        compiler_params=pltpu.CompilerParams(
            dimension_semantics=("parallel", "parallel"),
            vmem_limit_bytes=vmem_limit,
        ),
        cost_estimate=cost,
    )


def full_attention(queries, keys, values, scale=None):
    """queries (B,L,H,E), keys (B,S,H,E), values (B,S,H,D) -> (B,L,H,D)."""
    B, L, H, E = queries.shape
    _, S, _, D = values.shape
    scale = scale if scale is not None else 1.0 / math.sqrt(E)
    itemsize = queries.dtype.itemsize

    # Free (metadata-only) reshapes: fold the trailing (H, E)/(H, D) dims so
    # every kernel tile is a dense 2-D slab in the native memory layout.
    q2 = queries.reshape(B, L, H * E)
    k2 = keys.reshape(B, S, H * E)
    v2 = values.reshape(B, S, H * D)

    capacity = _vmem_capacity_bytes()
    budget = int(0.75 * capacity)
    bt, tl = _select_tiles(B, L, S, H, E, D, itemsize, budget)
    bytes_est = _vmem_estimate(bt, tl, S, H, E, D, itemsize)
    # Generation-aware compiler limit (~51 MiB on v7x, ~102 MiB on v5e/v6e).
    vmem_limit = int(min(int(0.8 * capacity),
                         max(32 * 1024 * 1024, 2 * bytes_est)))

    cost = pl.CostEstimate(
        flops=2 * B * H * L * S * (E + D),
        transcendentals=B * H * L * S,
        bytes_accessed=(q2.size + k2.size + v2.size + B * L * H * D) * itemsize,
    )

    kernel = functools.partial(_attn_kernel, scale=scale, num_heads=H,
                               e_dim=E, d_dim=D, batch_tile=bt)

    try:
        call = _build_call(kernel, B, L, S, H, E, D, queries.dtype, bt, tl,
                           vmem_limit, cost,
                           single_buffer_kv=hasattr(pl, "Buffered"))
        out = call(q2, k2, v2)
    except Exception:
        # Fallback: default (double) buffering on K/V if pipeline_mode or
        # pl.Buffered(1) is rejected by this runtime.
        call = _build_call(kernel, B, L, S, H, E, D, queries.dtype, bt, tl,
                           vmem_limit, cost, single_buffer_kv=False)
        out = call(q2, k2, v2)

    return out.reshape(B, L, H, D)


def _reference(queries, keys, values, scale=None):
    B, L, H, E = queries.shape
    scale = scale if scale is not None else 1.0 / math.sqrt(E)
    scores = jnp.einsum('blhe,bshe->bhls', queries, keys)
    A = jax.nn.softmax(scale * scores, axis=-1)
    return jnp.einsum('bhls,bshd->blhd', A, values)


if __name__ == "__main__":
    key = jax.random.PRNGKey(0)
    B, L, S, H, E, D = 2, 8, 8, 2, 32, 32
    kq, kk, kv = jax.random.split(key, 3)
    queries = jax.random.normal(kq, (B, L, H, E), dtype=jnp.float32)
    keys = jax.random.normal(kk, (B, S, H, E), dtype=jnp.float32)
    values = jax.random.normal(kv, (B, S, H, D), dtype=jnp.float32)

    out = full_attention(queries, keys, values)
    out = jax.block_until_ready(out)

    ref = _reference(queries, keys, values)
    assert out.shape == (B, L, H, D)
    # Tolerance accounts for the EUP approximate reciprocal in the softmax.
    assert jnp.allclose(out, ref, atol=5e-3, rtol=5e-3)
    print("KERNEL_OK")
</pallas_src>

<mosaic_0001>
module attributes {stable_mosaic.version = 11 : i64} {
  func.func @_attn_kernel(%arg0: i32, %arg1: i32, %arg2: memref<2x8x64xf32, #tpu.memory_space<vmem>>, %arg3: memref<2x8x64xf32, #tpu.memory_space<vmem>>, %arg4: memref<2x8x64xf32, #tpu.memory_space<vmem>>, %arg5: memref<2x8x64xf32, #tpu.memory_space<vmem>>) attributes {dimension_semantics = [#tpu.dimension_semantics<parallel>, #tpu.dimension_semantics<parallel>], iteration_bounds = array<i64: 1, 1>, scalar_prefetch = 0 : i64, scratch_operands = 0 : i64, tpu.core_type = #tpu.core_type<tc>, window_params = [{transform_indices = @transform_0, window_bounds = array<i64: 2, 8, 64>}, {pipeline_mode = #tpu.pipeline_mode<synchronous>, transform_indices = @transform_1, window_bounds = array<i64: 2, 8, 64>}, {pipeline_mode = #tpu.pipeline_mode<synchronous>, transform_indices = @transform_2, window_bounds = array<i64: 2, 8, 64>}, {transform_indices = @transform_3, window_bounds = array<i64: 2, 8, 64>}]} {
    %c0 = arith.constant 0 : index
    %c0_0 = arith.constant 0 : index
    %c0_1 = arith.constant 0 : index
    %0 = vector.load %arg2[%c0, %c0_0, %c0_1] : memref<2x8x64xf32, #tpu.memory_space<vmem>>, vector<1x8x32xf32>
    %1 = vector.shape_cast %0 : vector<1x8x32xf32> to vector<8x32xf32>
    %cst = arith.constant 0.176776692 : f32
    %2 = vector.broadcast %cst : f32 to vector<8x32xf32>
    %3 = arith.mulf %1, %2 : vector<8x32xf32>
    %c0_2 = arith.constant 0 : index
    %c0_3 = arith.constant 0 : index
    %c0_4 = arith.constant 0 : index
    %4 = vector.load %arg3[%c0_2, %c0_3, %c0_4] : memref<2x8x64xf32, #tpu.memory_space<vmem>>, vector<1x8x32xf32>
    %5 = vector.shape_cast %4 : vector<1x8x32xf32> to vector<8x32xf32>
    %c0_5 = arith.constant 0 : index
    %c0_6 = arith.constant 0 : index
    %c0_7 = arith.constant 0 : index
    %6 = vector.load %arg4[%c0_5, %c0_6, %c0_7] : memref<2x8x64xf32, #tpu.memory_space<vmem>>, vector<1x8x32xf32>
    %7 = vector.shape_cast %6 : vector<1x8x32xf32> to vector<8x32xf32>
    %cst_8 = arith.constant dense<0.000000e+00> : vector<8x8xf32>
    %8 = tpu.matmul %3, %5, %cst_8 {dimension_numbers = #tpu.dot_dimension_numbers<[1], [1], [0], [0], [0, 0, 1, 0], [], []>} : vector<8x32xf32>, vector<8x32xf32>, vector<8x8xf32> -> vector<8x8xf32>
    %cst_9 = arith.constant dense<0xFF800000> : vector<8xf32>
    %9 = vector.multi_reduction <maximumf>, %8, %cst_9 [1] : vector<8x8xf32> to vector<8xf32>
    %10 = vector.shape_cast %9 : vector<8xf32> to vector<8x1xf32>
    %11 = vector.broadcast %10 : vector<8x1xf32> to vector<8x8xf32>
    %12 = arith.subf %8, %11 : vector<8x8xf32>
    %13 = math.exp %12 : vector<8x8xf32>
    %cst_10 = arith.constant dense<0.000000e+00> : vector<8xf32>
    %14 = vector.multi_reduction <add>, %13, %cst_10 [1] : vector<8x8xf32> to vector<8xf32>
    %15 = vector.shape_cast %14 : vector<8xf32> to vector<8x1xf32>
    %cst_11 = arith.constant dense<0.000000e+00> : vector<8x32xf32>
    %16 = tpu.matmul %13, %7, %cst_11 {dimension_numbers = #tpu.dot_dimension_numbers<[1], [0], [0], [1], [0, 0, 1, 1], [], []>} : vector<8x8xf32>, vector<8x32xf32>, vector<8x32xf32> -> vector<8x32xf32>
    %17 = tpu.reciprocal %15 {approx = true} : vector<8x1xf32> -> vector<8x1xf32>
    %18 = vector.broadcast %17 : vector<8x1xf32> to vector<8x32xf32>
    %19 = arith.mulf %16, %18 : vector<8x32xf32>
    %c0_12 = arith.constant 0 : index
    %c0_13 = arith.constant 0 : index
    %c0_14 = arith.constant 0 : index
    %20 = vector.load %arg5[%c0_12, %c0_13, %c0_14] : memref<2x8x64xf32, #tpu.memory_space<vmem>>, vector<1x8x32xf32>
    %21 = vector.shape_cast %20 : vector<1x8x32xf32> to vector<8x32xf32>
    %22 = vector.shape_cast %19 : vector<8x32xf32> to vector<1x8x32xf32>
    tpu.vector_store %arg5[%c0_12, %c0_13, %c0_14], %22 {strides = array<i32>} : memref<2x8x64xf32, #tpu.memory_space<vmem>>, vector<1x8x32xf32>,
    %c0_15 = arith.constant 0 : index
    %c0_16 = arith.constant 0 : index
    %c32 = arith.constant 32 : index
    %23 = vector.load %arg2[%c0_15, %c0_16, %c32] : memref<2x8x64xf32, #tpu.memory_space<vmem>>, vector<1x8x32xf32>
    %24 = vector.shape_cast %23 : vector<1x8x32xf32> to vector<8x32xf32>
    %cst_17 = arith.constant 0.176776692 : f32
    %25 = vector.broadcast %cst_17 : f32 to vector<8x32xf32>
    %26 = arith.mulf %24, %25 : vector<8x32xf32>
    %c0_18 = arith.constant 0 : index
    %c0_19 = arith.constant 0 : index
    %c32_20 = arith.constant 32 : index
    %27 = vector.load %arg3[%c0_18, %c0_19, %c32_20] : memref<2x8x64xf32, #tpu.memory_space<vmem>>, vector<1x8x32xf32>
    %28 = vector.shape_cast %27 : vector<1x8x32xf32> to vector<8x32xf32>
    %c0_21 = arith.constant 0 : index
    %c0_22 = arith.constant 0 : index
    %c32_23 = arith.constant 32 : index
    %29 = vector.load %arg4[%c0_21, %c0_22, %c32_23] : memref<2x8x64xf32, #tpu.memory_space<vmem>>, vector<1x8x32xf32>
    %30 = vector.shape_cast %29 : vector<1x8x32xf32> to vector<8x32xf32>
    %cst_24 = arith.constant dense<0.000000e+00> : vector<8x8xf32>
    %31 = tpu.matmul %26, %28, %cst_24 {dimension_numbers = #tpu.dot_dimension_numbers<[1], [1], [0], [0], [0, 0, 1, 0], [], []>} : vector<8x32xf32>, vector<8x32xf32>, vector<8x8xf32> -> vector<8x8xf32>
    %cst_25 = arith.constant dense<0xFF800000> : vector<8xf32>
    %32 = vector.multi_reduction <maximumf>, %31, %cst_25 [1] : vector<8x8xf32> to vector<8xf32>
    %33 = vector.shape_cast %32 : vector<8xf32> to vector<8x1xf32>
    %34 = vector.broadcast %33 : vector<8x1xf32> to vector<8x8xf32>
    %35 = arith.subf %31, %34 : vector<8x8xf32>
    %36 = math.exp %35 : vector<8x8xf32>
    %cst_26 = arith.constant dense<0.000000e+00> : vector<8xf32>
    %37 = vector.multi_reduction <add>, %36, %cst_26 [1] : vector<8x8xf32> to vector<8xf32>
    %38 = vector.shape_cast %37 : vector<8xf32> to vector<8x1xf32>
    %cst_27 = arith.constant dense<0.000000e+00> : vector<8x32xf32>
    %39 = tpu.matmul %36, %30, %cst_27 {dimension_numbers = #tpu.dot_dimension_numbers<[1], [0], [0], [1], [0, 0, 1, 1], [], []>} : vector<8x8xf32>, vector<8x32xf32>, vector<8x32xf32> -> vector<8x32xf32>
    %40 = tpu.reciprocal %38 {approx = true} : vector<8x1xf32> -> vector<8x1xf32>
    %41 = vector.broadcast %40 : vector<8x1xf32> to vector<8x32xf32>
    %42 = arith.mulf %39, %41 : vector<8x32xf32>
    %c0_28 = arith.constant 0 : index
    %c0_29 = arith.constant 0 : index
    %c32_30 = arith.constant 32 : index
    %43 = vector.load %arg5[%c0_28, %c0_29, %c32_30] : memref<2x8x64xf32, #tpu.memory_space<vmem>>, vector<1x8x32xf32>
    %44 = vector.shape_cast %43 : vector<1x8x32xf32> to vector<8x32xf32>
    %45 = vector.shape_cast %42 : vector<8x32xf32> to vector<1x8x32xf32>
    tpu.vector_store %arg5[%c0_28, %c0_29, %c32_30], %45 {strides = array<i32>} : memref<2x8x64xf32, #tpu.memory_space<vmem>>, vector<1x8x32xf32>,
    %c1 = arith.constant 1 : index
    %c0_31 = arith.constant 0 : index
    %c0_32 = arith.constant 0 : index
    %46 = vector.load %arg2[%c1, %c0_31, %c0_32] : memref<2x8x64xf32, #tpu.memory_space<vmem>>, vector<1x8x32xf32>
    %47 = vector.shape_cast %46 : vector<1x8x32xf32> to vector<8x32xf32>
    %cst_33 = arith.constant 0.176776692 : f32
    %48 = vector.broadcast %cst_33 : f32 to vector<8x32xf32>
    %49 = arith.mulf %47, %48 : vector<8x32xf32>
    %c1_34 = arith.constant 1 : index
    %c0_35 = arith.constant 0 : index
    %c0_36 = arith.constant 0 : index
    %50 = vector.load %arg3[%c1_34, %c0_35, %c0_36] : memref<2x8x64xf32, #tpu.memory_space<vmem>>, vector<1x8x32xf32>
    %51 = vector.shape_cast %50 : vector<1x8x32xf32> to vector<8x32xf32>
    %c1_37 = arith.constant 1 : index
    %c0_38 = arith.constant 0 : index
    %c0_39 = arith.constant 0 : index
    %52 = vector.load %arg4[%c1_37, %c0_38, %c0_39] : memref<2x8x64xf32, #tpu.memory_space<vmem>>, vector<1x8x32xf32>
    %53 = vector.shape_cast %52 : vector<1x8x32xf32> to vector<8x32xf32>
    %cst_40 = arith.constant dense<0.000000e+00> : vector<8x8xf32>
    %54 = tpu.matmul %49, %51, %cst_40 {dimension_numbers = #tpu.dot_dimension_numbers<[1], [1], [0], [0], [0, 0, 1, 0], [], []>} : vector<8x32xf32>, vector<8x32xf32>, vector<8x8xf32> -> vector<8x8xf32>
    %cst_41 = arith.constant dense<0xFF800000> : vector<8xf32>
    %55 = vector.multi_reduction <maximumf>, %54, %cst_41 [1] : vector<8x8xf32> to vector<8xf32>
    %56 = vector.shape_cast %55 : vector<8xf32> to vector<8x1xf32>
    %57 = vector.broadcast %56 : vector<8x1xf32> to vector<8x8xf32>
    %58 = arith.subf %54, %57 : vector<8x8xf32>
    %59 = math.exp %58 : vector<8x8xf32>
    %cst_42 = arith.constant dense<0.000000e+00> : vector<8xf32>
    %60 = vector.multi_reduction <add>, %59, %cst_42 [1] : vector<8x8xf32> to vector<8xf32>
    %61 = vector.shape_cast %60 : vector<8xf32> to vector<8x1xf32>
    %cst_43 = arith.constant dense<0.000000e+00> : vector<8x32xf32>
    %62 = tpu.matmul %59, %53, %cst_43 {dimension_numbers = #tpu.dot_dimension_numbers<[1], [0], [0], [1], [0, 0, 1, 1], [], []>} : vector<8x8xf32>, vector<8x32xf32>, vector<8x32xf32> -> vector<8x32xf32>
    %63 = tpu.reciprocal %61 {approx = true} : vector<8x1xf32> -> vector<8x1xf32>
    %64 = vector.broadcast %63 : vector<8x1xf32> to vector<8x32xf32>
    %65 = arith.mulf %62, %64 : vector<8x32xf32>
    %c1_44 = arith.constant 1 : index
    %c0_45 = arith.constant 0 : index
    %c0_46 = arith.constant 0 : index
    %66 = vector.load %arg5[%c1_44, %c0_45, %c0_46] : memref<2x8x64xf32, #tpu.memory_space<vmem>>, vector<1x8x32xf32>
    %67 = vector.shape_cast %66 : vector<1x8x32xf32> to vector<8x32xf32>
    %68 = vector.shape_cast %65 : vector<8x32xf32> to vector<1x8x32xf32>
    tpu.vector_store %arg5[%c1_44, %c0_45, %c0_46], %68 {strides = array<i32>} : memref<2x8x64xf32, #tpu.memory_space<vmem>>, vector<1x8x32xf32>,
    %c1_47 = arith.constant 1 : index
    %c0_48 = arith.constant 0 : index
    %c32_49 = arith.constant 32 : index
    %69 = vector.load %arg2[%c1_47, %c0_48, %c32_49] : memref<2x8x64xf32, #tpu.memory_space<vmem>>, vector<1x8x32xf32>
    %70 = vector.shape_cast %69 : vector<1x8x32xf32> to vector<8x32xf32>
    %cst_50 = arith.constant 0.176776692 : f32
    %71 = vector.broadcast %cst_50 : f32 to vector<8x32xf32>
    %72 = arith.mulf %70, %71 : vector<8x32xf32>
    %c1_51 = arith.constant 1 : index
    %c0_52 = arith.constant 0 : index
    %c32_53 = arith.constant 32 : index
    %73 = vector.load %arg3[%c1_51, %c0_52, %c32_53] : memref<2x8x64xf32, #tpu.memory_space<vmem>>, vector<1x8x32xf32>
    %74 = vector.shape_cast %73 : vector<1x8x32xf32> to vector<8x32xf32>
    %c1_54 = arith.constant 1 : index
    %c0_55 = arith.constant 0 : index
    %c32_56 = arith.constant 32 : index
    %75 = vector.load %arg4[%c1_54, %c0_55, %c32_56] : memref<2x8x64xf32, #tpu.memory_space<vmem>>, vector<1x8x32xf32>
    %76 = vector.shape_cast %75 : vector<1x8x32xf32> to vector<8x32xf32>
    %cst_57 = arith.constant dense<0.000000e+00> : vector<8x8xf32>
    %77 = tpu.matmul %72, %74, %cst_57 {dimension_numbers = #tpu.dot_dimension_numbers<[1], [1], [0], [0], [0, 0, 1, 0], [], []>} : vector<8x32xf32>, vector<8x32xf32>, vector<8x8xf32> -> vector<8x8xf32>
    %cst_58 = arith.constant dense<0xFF800000> : vector<8xf32>
    %78 = vector.multi_reduction <maximumf>, %77, %cst_58 [1] : vector<8x8xf32> to vector<8xf32>
    %79 = vector.shape_cast %78 : vector<8xf32> to vector<8x1xf32>
    %80 = vector.broadcast %79 : vector<8x1xf32> to vector<8x8xf32>
    %81 = arith.subf %77, %80 : vector<8x8xf32>
    %82 = math.exp %81 : vector<8x8xf32>
    %cst_59 = arith.constant dense<0.000000e+00> : vector<8xf32>
    %83 = vector.multi_reduction <add>, %82, %cst_59 [1] : vector<8x8xf32> to vector<8xf32>
    %84 = vector.shape_cast %83 : vector<8xf32> to vector<8x1xf32>
    %cst_60 = arith.constant dense<0.000000e+00> : vector<8x32xf32>
    %85 = tpu.matmul %82, %76, %cst_60 {dimension_numbers = #tpu.dot_dimension_numbers<[1], [0], [0], [1], [0, 0, 1, 1], [], []>} : vector<8x8xf32>, vector<8x32xf32>, vector<8x32xf32> -> vector<8x32xf32>
    %86 = tpu.reciprocal %84 {approx = true} : vector<8x1xf32> -> vector<8x1xf32>
    %87 = vector.broadcast %86 : vector<8x1xf32> to vector<8x32xf32>
    %88 = arith.mulf %85, %87 : vector<8x32xf32>
    %c1_61 = arith.constant 1 : index
    %c0_62 = arith.constant 0 : index
    %c32_63 = arith.constant 32 : index
    %89 = vector.load %arg5[%c1_61, %c0_62, %c32_63] : memref<2x8x64xf32, #tpu.memory_space<vmem>>, vector<1x8x32xf32>
    %90 = vector.shape_cast %89 : vector<1x8x32xf32> to vector<8x32xf32>
    %91 = vector.shape_cast %88 : vector<8x32xf32> to vector<1x8x32xf32>
    tpu.vector_store %arg5[%c1_61, %c0_62, %c32_63], %91 {strides = array<i32>} : memref<2x8x64xf32, #tpu.memory_space<vmem>>, vector<1x8x32xf32>,
    return
  }
  func.func @transform_0(%arg0: i32, %arg1: i32) -> (i32, i32, i32) {
    %c0_i32 = arith.constant 0 : i32
    %c0_i32_0 = arith.constant 0 : i32
    return %arg0, %arg1, %c0_i32 : i32, i32, i32
  }
  func.func @transform_1(%arg0: i32, %arg1: i32) -> (i32, i32, i32) {
    %c0_i32 = arith.constant 0 : i32
    %c0_i32_0 = arith.constant 0 : i32
    %c0_i32_1 = arith.constant 0 : i32
    return %arg0, %c0_i32, %c0_i32_0 : i32, i32, i32
  }
  func.func @transform_2(%arg0: i32, %arg1: i32) -> (i32, i32, i32) {
    %c0_i32 = arith.constant 0 : i32
    %c0_i32_0 = arith.constant 0 : i32
    %c0_i32_1 = arith.constant 0 : i32
    return %arg0, %c0_i32, %c0_i32_0 : i32, i32, i32
  }
  func.func @transform_3(%arg0: i32, %arg1: i32) -> (i32, i32, i32) {
    %c0_i32 = arith.constant 0 : i32
    %c0_i32_0 = arith.constant 0 : i32
    return %arg0, %arg1, %c0_i32 : i32, i32, i32
  }
}

module attributes {stable_mosaic.version = 11 : i64} {
  func.func @_attn_kernel(%arg0: i32, %arg1: i32, %arg2: memref<2x8x64xf32, #tpu.memory_space<vmem>>, %arg3: memref<2x8x64xf32, #tpu.memory_space<vmem>>, %arg4: memref<2x8x64xf32, #tpu.memory_space<vmem>>, %arg5: memref<2x8x64xf32, #tpu.memory_space<vmem>>) attributes {dimension_semantics = [#tpu.dimension_semantics<parallel>, #tpu.dimension_semantics<parallel>], iteration_bounds = array<i64: 1, 1>, scalar_prefetch = 0 : i64, scratch_operands = 0 : i64, tpu.core_type = #tpu.core_type<tc>, window_params = [{transform_indices = @transform_0, window_bounds = array<i64: 2, 8, 64>}, {transform_indices = @transform_1, window_bounds = array<i64: 2, 8, 64>}, {transform_indices = @transform_2, window_bounds = array<i64: 2, 8, 64>}, {transform_indices = @transform_3, window_bounds = array<i64: 2, 8, 64>}]} {
    %c0 = arith.constant 0 : index
    %c0_0 = arith.constant 0 : index
    %c0_1 = arith.constant 0 : index
    %0 = vector.load %arg2[%c0, %c0_0, %c0_1] : memref<2x8x64xf32, #tpu.memory_space<vmem>>, vector<1x8x32xf32>
    %1 = vector.shape_cast %0 : vector<1x8x32xf32> to vector<8x32xf32>
    %cst = arith.constant 0.176776692 : f32
    %2 = vector.broadcast %cst : f32 to vector<8x32xf32>
    %3 = arith.mulf %1, %2 : vector<8x32xf32>
    %c0_2 = arith.constant 0 : index
    %c0_3 = arith.constant 0 : index
    %c0_4 = arith.constant 0 : index
    %4 = vector.load %arg3[%c0_2, %c0_3, %c0_4] : memref<2x8x64xf32, #tpu.memory_space<vmem>>, vector<1x8x32xf32>
    %5 = vector.shape_cast %4 : vector<1x8x32xf32> to vector<8x32xf32>
    %c0_5 = arith.constant 0 : index
    %c0_6 = arith.constant 0 : index
    %c0_7 = arith.constant 0 : index
    %6 = vector.load %arg4[%c0_5, %c0_6, %c0_7] : memref<2x8x64xf32, #tpu.memory_space<vmem>>, vector<1x8x32xf32>
    %7 = vector.shape_cast %6 : vector<1x8x32xf32> to vector<8x32xf32>
    %cst_8 = arith.constant dense<0.000000e+00> : vector<8x8xf32>
    %8 = tpu.matmul %3, %5, %cst_8 {dimension_numbers = #tpu.dot_dimension_numbers<[1], [1], [0], [0], [0, 0, 1, 0], [], []>} : vector<8x32xf32>, vector<8x32xf32>, vector<8x8xf32> -> vector<8x8xf32>
    %cst_9 = arith.constant dense<0xFF800000> : vector<8xf32>
    %9 = vector.multi_reduction <maximumf>, %8, %cst_9 [1] : vector<8x8xf32> to vector<8xf32>
    %10 = vector.shape_cast %9 : vector<8xf32> to vector<8x1xf32>
    %11 = vector.broadcast %10 : vector<8x1xf32> to vector<8x8xf32>
    %12 = arith.subf %8, %11 : vector<8x8xf32>
    %13 = math.exp %12 : vector<8x8xf32>
    %cst_10 = arith.constant dense<0.000000e+00> : vector<8xf32>
    %14 = vector.multi_reduction <add>, %13, %cst_10 [1] : vector<8x8xf32> to vector<8xf32>
    %15 = vector.shape_cast %14 : vector<8xf32> to vector<8x1xf32>
    %cst_11 = arith.constant dense<0.000000e+00> : vector<8x32xf32>
    %16 = tpu.matmul %13, %7, %cst_11 {dimension_numbers = #tpu.dot_dimension_numbers<[1], [0], [0], [1], [0, 0, 1, 1], [], []>} : vector<8x8xf32>, vector<8x32xf32>, vector<8x32xf32> -> vector<8x32xf32>
    %17 = tpu.reciprocal %15 {approx = true} : vector<8x1xf32> -> vector<8x1xf32>
    %18 = vector.broadcast %17 : vector<8x1xf32> to vector<8x32xf32>
    %19 = arith.mulf %16, %18 : vector<8x32xf32>
    %c0_12 = arith.constant 0 : index
    %c0_13 = arith.constant 0 : index
    %c0_14 = arith.constant 0 : index
    %20 = vector.load %arg5[%c0_12, %c0_13, %c0_14] : memref<2x8x64xf32, #tpu.memory_space<vmem>>, vector<1x8x32xf32>
    %21 = vector.shape_cast %20 : vector<1x8x32xf32> to vector<8x32xf32>
    %22 = vector.shape_cast %19 : vector<8x32xf32> to vector<1x8x32xf32>
    tpu.vector_store %arg5[%c0_12, %c0_13, %c0_14], %22 {strides = array<i32>} : memref<2x8x64xf32, #tpu.memory_space<vmem>>, vector<1x8x32xf32>,
    %c0_15 = arith.constant 0 : index
    %c0_16 = arith.constant 0 : index
    %c32 = arith.constant 32 : index
    %23 = vector.load %arg2[%c0_15, %c0_16, %c32] : memref<2x8x64xf32, #tpu.memory_space<vmem>>, vector<1x8x32xf32>
    %24 = vector.shape_cast %23 : vector<1x8x32xf32> to vector<8x32xf32>
    %cst_17 = arith.constant 0.176776692 : f32
    %25 = vector.broadcast %cst_17 : f32 to vector<8x32xf32>
    %26 = arith.mulf %24, %25 : vector<8x32xf32>
    %c0_18 = arith.constant 0 : index
    %c0_19 = arith.constant 0 : index
    %c32_20 = arith.constant 32 : index
    %27 = vector.load %arg3[%c0_18, %c0_19, %c32_20] : memref<2x8x64xf32, #tpu.memory_space<vmem>>, vector<1x8x32xf32>
    %28 = vector.shape_cast %27 : vector<1x8x32xf32> to vector<8x32xf32>
    %c0_21 = arith.constant 0 : index
    %c0_22 = arith.constant 0 : index
    %c32_23 = arith.constant 32 : index
    %29 = vector.load %arg4[%c0_21, %c0_22, %c32_23] : memref<2x8x64xf32, #tpu.memory_space<vmem>>, vector<1x8x32xf32>
    %30 = vector.shape_cast %29 : vector<1x8x32xf32> to vector<8x32xf32>
    %cst_24 = arith.constant dense<0.000000e+00> : vector<8x8xf32>
    %31 = tpu.matmul %26, %28, %cst_24 {dimension_numbers = #tpu.dot_dimension_numbers<[1], [1], [0], [0], [0, 0, 1, 0], [], []>} : vector<8x32xf32>, vector<8x32xf32>, vector<8x8xf32> -> vector<8x8xf32>
    %cst_25 = arith.constant dense<0xFF800000> : vector<8xf32>
    %32 = vector.multi_reduction <maximumf>, %31, %cst_25 [1] : vector<8x8xf32> to vector<8xf32>
    %33 = vector.shape_cast %32 : vector<8xf32> to vector<8x1xf32>
    %34 = vector.broadcast %33 : vector<8x1xf32> to vector<8x8xf32>
    %35 = arith.subf %31, %34 : vector<8x8xf32>
    %36 = math.exp %35 : vector<8x8xf32>
    %cst_26 = arith.constant dense<0.000000e+00> : vector<8xf32>
    %37 = vector.multi_reduction <add>, %36, %cst_26 [1] : vector<8x8xf32> to vector<8xf32>
    %38 = vector.shape_cast %37 : vector<8xf32> to vector<8x1xf32>
    %cst_27 = arith.constant dense<0.000000e+00> : vector<8x32xf32>
    %39 = tpu.matmul %36, %30, %cst_27 {dimension_numbers = #tpu.dot_dimension_numbers<[1], [0], [0], [1], [0, 0, 1, 1], [], []>} : vector<8x8xf32>, vector<8x32xf32>, vector<8x32xf32> -> vector<8x32xf32>
    %40 = tpu.reciprocal %38 {approx = true} : vector<8x1xf32> -> vector<8x1xf32>
    %41 = vector.broadcast %40 : vector<8x1xf32> to vector<8x32xf32>
    %42 = arith.mulf %39, %41 : vector<8x32xf32>
    %c0_28 = arith.constant 0 : index
    %c0_29 = arith.constant 0 : index
    %c32_30 = arith.constant 32 : index
    %43 = vector.load %arg5[%c0_28, %c0_29, %c32_30] : memref<2x8x64xf32, #tpu.memory_space<vmem>>, vector<1x8x32xf32>
    %44 = vector.shape_cast %43 : vector<1x8x32xf32> to vector<8x32xf32>
    %45 = vector.shape_cast %42 : vector<8x32xf32> to vector<1x8x32xf32>
    tpu.vector_store %arg5[%c0_28, %c0_29, %c32_30], %45 {strides = array<i32>} : memref<2x8x64xf32, #tpu.memory_space<vmem>>, vector<1x8x32xf32>,
    %c1 = arith.constant 1 : index
    %c0_31 = arith.constant 0 : index
    %c0_32 = arith.constant 0 : index
    %46 = vector.load %arg2[%c1, %c0_31, %c0_32] : memref<2x8x64xf32, #tpu.memory_space<vmem>>, vector<1x8x32xf32>
    %47 = vector.shape_cast %46 : vector<1x8x32xf32> to vector<8x32xf32>
    %cst_33 = arith.constant 0.176776692 : f32
    %48 = vector.broadcast %cst_33 : f32 to vector<8x32xf32>
    %49 = arith.mulf %47, %48 : vector<8x32xf32>
    %c1_34 = arith.constant 1 : index
    %c0_35 = arith.constant 0 : index
    %c0_36 = arith.constant 0 : index
    %50 = vector.load %arg3[%c1_34, %c0_35, %c0_36] : memref<2x8x64xf32, #tpu.memory_space<vmem>>, vector<1x8x32xf32>
    %51 = vector.shape_cast %50 : vector<1x8x32xf32> to vector<8x32xf32>
    %c1_37 = arith.constant 1 : index
    %c0_38 = arith.constant 0 : index
    %c0_39 = arith.constant 0 : index
    %52 = vector.load %arg4[%c1_37, %c0_38, %c0_39] : memref<2x8x64xf32, #tpu.memory_space<vmem>>, vector<1x8x32xf32>
    %53 = vector.shape_cast %52 : vector<1x8x32xf32> to vector<8x32xf32>
    %cst_40 = arith.constant dense<0.000000e+00> : vector<8x8xf32>
    %54 = tpu.matmul %49, %51, %cst_40 {dimension_numbers = #tpu.dot_dimension_numbers<[1], [1], [0], [0], [0, 0, 1, 0], [], []>} : vector<8x32xf32>, vector<8x32xf32>, vector<8x8xf32> -> vector<8x8xf32>
    %cst_41 = arith.constant dense<0xFF800000> : vector<8xf32>
    %55 = vector.multi_reduction <maximumf>, %54, %cst_41 [1] : vector<8x8xf32> to vector<8xf32>
    %56 = vector.shape_cast %55 : vector<8xf32> to vector<8x1xf32>
    %57 = vector.broadcast %56 : vector<8x1xf32> to vector<8x8xf32>
    %58 = arith.subf %54, %57 : vector<8x8xf32>
    %59 = math.exp %58 : vector<8x8xf32>
    %cst_42 = arith.constant dense<0.000000e+00> : vector<8xf32>
    %60 = vector.multi_reduction <add>, %59, %cst_42 [1] : vector<8x8xf32> to vector<8xf32>
    %61 = vector.shape_cast %60 : vector<8xf32> to vector<8x1xf32>
    %cst_43 = arith.constant dense<0.000000e+00> : vector<8x32xf32>
    %62 = tpu.matmul %59, %53, %cst_43 {dimension_numbers = #tpu.dot_dimension_numbers<[1], [0], [0], [1], [0, 0, 1, 1], [], []>} : vector<8x8xf32>, vector<8x32xf32>, vector<8x32xf32> -> vector<8x32xf32>
    %63 = tpu.reciprocal %61 {approx = true} : vector<8x1xf32> -> vector<8x1xf32>
    %64 = vector.broadcast %63 : vector<8x1xf32> to vector<8x32xf32>
    %65 = arith.mulf %62, %64 : vector<8x32xf32>
    %c1_44 = arith.constant 1 : index
    %c0_45 = arith.constant 0 : index
    %c0_46 = arith.constant 0 : index
    %66 = vector.load %arg5[%c1_44, %c0_45, %c0_46] : memref<2x8x64xf32, #tpu.memory_space<vmem>>, vector<1x8x32xf32>
    %67 = vector.shape_cast %66 : vector<1x8x32xf32> to vector<8x32xf32>
    %68 = vector.shape_cast %65 : vector<8x32xf32> to vector<1x8x32xf32>
    tpu.vector_store %arg5[%c1_44, %c0_45, %c0_46], %68 {strides = array<i32>} : memref<2x8x64xf32, #tpu.memory_space<vmem>>, vector<1x8x32xf32>,
    %c1_47 = arith.constant 1 : index
    %c0_48 = arith.constant 0 : index
    %c32_49 = arith.constant 32 : index
    %69 = vector.load %arg2[%c1_47, %c0_48, %c32_49] : memref<2x8x64xf32, #tpu.memory_space<vmem>>, vector<1x8x32xf32>
    %70 = vector.shape_cast %69 : vector<1x8x32xf32> to vector<8x32xf32>
    %cst_50 = arith.constant 0.176776692 : f32
    %71 = vector.broadcast %cst_50 : f32 to vector<8x32xf32>
    %72 = arith.mulf %70, %71 : vector<8x32xf32>
    %c1_51 = arith.constant 1 : index
    %c0_52 = arith.constant 0 : index
    %c32_53 = arith.constant 32 : index
    %73 = vector.load %arg3[%c1_51, %c0_52, %c32_53] : memref<2x8x64xf32, #tpu.memory_space<vmem>>, vector<1x8x32xf32>
    %74 = vector.shape_cast %73 : vector<1x8x32xf32> to vector<8x32xf32>
    %c1_54 = arith.constant 1 : index
    %c0_55 = arith.constant 0 : index
    %c32_56 = arith.constant 32 : index
    %75 = vector.load %arg4[%c1_54, %c0_55, %c32_56] : memref<2x8x64xf32, #tpu.memory_space<vmem>>, vector<1x8x32xf32>
    %76 = vector.shape_cast %75 : vector<1x8x32xf32> to vector<8x32xf32>
    %cst_57 = arith.constant dense<0.000000e+00> : vector<8x8xf32>
    %77 = tpu.matmul %72, %74, %cst_57 {dimension_numbers = #tpu.dot_dimension_numbers<[1], [1], [0], [0], [0, 0, 1, 0], [], []>} : vector<8x32xf32>, vector<8x32xf32>, vector<8x8xf32> -> vector<8x8xf32>
    %cst_58 = arith.constant dense<0xFF800000> : vector<8xf32>
    %78 = vector.multi_reduction <maximumf>, %77, %cst_58 [1] : vector<8x8xf32> to vector<8xf32>
    %79 = vector.shape_cast %78 : vector<8xf32> to vector<8x1xf32>
    %80 = vector.broadcast %79 : vector<8x1xf32> to vector<8x8xf32>
    %81 = arith.subf %77, %80 : vector<8x8xf32>
    %82 = math.exp %81 : vector<8x8xf32>
    %cst_59 = arith.constant dense<0.000000e+00> : vector<8xf32>
    %83 = vector.multi_reduction <add>, %82, %cst_59 [1] : vector<8x8xf32> to vector<8xf32>
    %84 = vector.shape_cast %83 : vector<8xf32> to vector<8x1xf32>
    %cst_60 = arith.constant dense<0.000000e+00> : vector<8x32xf32>
    %85 = tpu.matmul %82, %76, %cst_60 {dimension_numbers = #tpu.dot_dimension_numbers<[1], [0], [0], [1], [0, 0, 1, 1], [], []>} : vector<8x8xf32>, vector<8x32xf32>, vector<8x32xf32> -> vector<8x32xf32>
    %86 = tpu.reciprocal %84 {approx = true} : vector<8x1xf32> -> vector<8x1xf32>
    %87 = vector.broadcast %86 : vector<8x1xf32> to vector<8x32xf32>
    %88 = arith.mulf %85, %87 : vector<8x32xf32>
    %c1_61 = arith.constant 1 : index
    %c0_62 = arith.constant 0 : index
    %c32_63 = arith.constant 32 : index
    %89 = vector.load %arg5[%c1_61, %c0_62, %c32_63] : memref<2x8x64xf32, #tpu.memory_space<vmem>>, vector<1x8x32xf32>
    %90 = vector.shape_cast %89 : vector<1x8x32xf32> to vector<8x32xf32>
    %91 = vector.shape_cast %88 : vector<8x32xf32> to vector<1x8x32xf32>
    tpu.vector_store %arg5[%c1_61, %c0_62, %c32_63], %91 {strides = array<i32>} : memref<2x8x64xf32, #tpu.memory_space<vmem>>, vector<1x8x32xf32>,
    return
  }
  func.func @transform_0(%arg0: i32, %arg1: i32) -> (i32, i32, i32) {
    %c0_i32 = arith.constant 0 : i32
    %c0_i32_0 = arith.constant 0 : i32
    return %arg0, %arg1, %c0_i32 : i32, i32, i32
  }
  func.func @transform_1(%arg0: i32, %arg1: i32) -> (i32, i32, i32) {
    %c0_i32 = arith.constant 0 : i32
    %c0_i32_0 = arith.constant 0 : i32
    %c0_i32_1 = arith.constant 0 : i32
    return %arg0, %c0_i32, %c0_i32_0 : i32, i32, i32
  }
  func.func @transform_2(%arg0: i32, %arg1: i32) -> (i32, i32, i32) {
    %c0_i32 = arith.constant 0 : i32
    %c0_i32_0 = arith.constant 0 : i32
    %c0_i32_1 = arith.constant 0 : i32
    return %arg0, %c0_i32, %c0_i32_0 : i32, i32, i32
  }
  func.func @transform_3(%arg0: i32, %arg1: i32) -> (i32, i32, i32) {
    %c0_i32 = arith.constant 0 : i32
    %c0_i32_0 = arith.constant 0 : i32
    return %arg0, %arg1, %c0_i32 : i32, i32, i32
  }
}

</mosaic_0001>

<bundles_post_ra>
// kernel: tpu_custom_call.1
= control target key start
LH: loop header
LB: loop body
LE: loop exit
PB: predicated region body
PF: predicated region fallthrough
CT: control target
= control target key end

     0   :  { %8 = vsyncpa [#allocation3], 0  ;;  %s1102_s0 = inlined_call_operand.hbm [shape: f32[2,8,64], index: 0, kind: input, shape index: {}]   ;;  %s1103_s1 = inlined_call_operand.hbm [shape: f32[2,8,64], index: 1, kind: input, shape index: {}]   ;;  %s1104_s2 = inlined_call_operand.hbm [shape: f32[2,8,64], index: 2, kind: input, shape index: {}]   ;;  %s1105_s3 = inlined_call_operand.hbm [shape: f32[2,8,64], index: 3, kind: output, shape index: {}]  }
   0x1   :  { %9 = vsyncpa [#allocation6], 0 }
   0x2   :  { %10 = vsyncpa [#allocation4], 0  ;;  %s953_s12 = smov [#allocation5]   ;;  %s954_s14 = smov [#allocation2]  }
   0x3   :  { %s28_s13 = sshll.u32 %s953_s12, 4  ;;  %s16_s15 = sshll.u32 %s954_s14, 4  ;;  %s29_s13 = int_to_ptr.vmem [resolvable:$true] %s28_s13  ;;  %s983_s15 = int_to_ptr.vmem [resolvable:$true] %s16_s15 }
   0x4   :  { %s859_s18 = scalar_lea.hbm %s1103_s1, 256 }
   0x5   :  { %p860_p0 = scmp.ne.s32.totalorder %s1103_s1, %s859_s18  ;;  %p863_p1 = scmp.lt.u32.totalorder %s859_s18, %s1103_s1 }
   0x7   :  { %p865_p2 = pnand %p863_p1, %p860_p0 }
   0x9   :  { %868 = shalt.err (!%p865_p2)
}
   0xa   :  { %s869_s23 = scalar_lea.vmem %s29_s13, 256  ;;  %p874_p4 = scmp.lt.s32.totalorder %s29_s13, %s29_s13 }
   0xb   :  { %p870_p3 = scmp.ne.s32.totalorder %s29_s13, %s869_s23  ;;  %p875_p5 = scmp.lt.s32.totalorder %s869_s23, %s869_s23 }
   0xd   :  { %p876_p6 = por %p875_p5, %p874_p4 }
   0xf   :  { %p877_p7 = pnand %p876_p6, %p870_p3 }
  0x11   :  { %880 = shalt.err (!%p877_p7)
}
  0x12   :  { %s955_s24 = smov 128   ;;  %s956_s25 = smov 8  }
  0x13   :  { %34 = dma.hbm_to_vmem [thread:$0]  %s1103_s1, 256, %s29_s13, [#allocation6], %s955_s24, %s955_s24, %s956_s25  }
  0x14   :  { %s881_s30 = scalar_lea.hbm %s1102_s0, 256 }
  0x15   :  { %p882_p8 = scmp.ne.s32.totalorder %s1102_s0, %s881_s30  ;;  %p885_p9 = scmp.lt.u32.totalorder %s881_s30, %s1102_s0 }
  0x17   :  { %p887_p10 = pnand %p885_p9, %p882_p8 }
  0x19   :  { %890 = shalt.err (!%p887_p10)
}
  0x1a   :  { %s891_s8 = scalar_lea.vmem %s983_s15, 256  ;;  %p896_p12 = scmp.lt.s32.totalorder %s983_s15, %s983_s15 }
  0x1b   :  { %p892_p11 = scmp.ne.s32.totalorder %s983_s15, %s891_s8  ;;  %p897_p13 = scmp.lt.s32.totalorder %s891_s8, %s891_s8 }
  0x1d   :  { %p898_p0 = por %p897_p13, %p896_p12 }
  0x1f   :  { %p899_p1 = pnand %p898_p0, %p892_p11 }
  0x21   :  { %902 = shalt.err (!%p899_p1)
}
  0x22   :  { %22 = dma.hbm_to_vmem [thread:$0]  %s1102_s0, 256, %s983_s15, [#allocation3], %s955_s24, %s955_s24, %s956_s25  }
  0x23   :  { %s957_s10 = smov [#allocation7]   ;;  %s903_s14 = scalar_lea.hbm %s1104_s2, 256 }
  0x24   :  { %s40_s11 = sshll.u32 %s957_s10, 4  ;;  %p904_p2 = scmp.ne.s32.totalorder %s1104_s2, %s903_s14  ;;  %s41_s11 = int_to_ptr.vmem [resolvable:$true] %s40_s11 }
  0x25   :  { %p907_p3 = scmp.lt.u32.totalorder %s903_s14, %s1104_s2 }
  0x27   :  { %p909_p4 = pnand %p907_p3, %p904_p2 }
  0x29   :  { %912 = shalt.err (!%p909_p4)
}
  0x2a   :  { %s913_s20 = scalar_lea.vmem %s41_s11, 256  ;;  %p918_p6 = scmp.lt.s32.totalorder %s41_s11, %s41_s11 }
  0x2b   :  { %p914_p5 = scmp.ne.s32.totalorder %s41_s11, %s913_s20  ;;  %p919_p7 = scmp.lt.s32.totalorder %s913_s20, %s913_s20 }
  0x2d   :  { %p920_p8 = por %p919_p7, %p918_p6 }
  0x2f   :  { %p921_p9 = pnand %p920_p8, %p914_p5 }
  0x31   :  { %924 = shalt.err (!%p921_p9)
}
  0x32   :  { %46 = dma.hbm_to_vmem [thread:$0]  %s1104_s2, 256, %s41_s11, [#allocation6], %s955_s24, %s955_s24, %s956_s25  }
  0x33   :  { %947 = dma.done.wait [#allocation3], 256  }
  0x34   :  { %948 = vsyncadd [#allocation3], 4294967040 }
  0x35   :  { %949 = dma.done.wait [#allocation6], 512  }
  0x36   :  { %950 = vsyncadd [#allocation6], 4294966784  ;;  %v958_v0 = vmov 0.0   ;;  %vm959_vm0 = vmmov 0   ;;  %vm60_vm1 = vcmask 261120   ;;  %v58_v1 = vld [vmem:[#allocation5] sm:$0xff] }
  0x37   :  { %793 = vmatprep.subr.mxu0 %v958_v0  ;;  %795 = vmatprep.mubr.msk.f32.mxu0 %vm959_vm0, %v958_v0  ;;  %v56_v2 = vld [vmem:[#allocation2] sm:$0xff]  ;;  %s960_s2 = smov 96   ;;  %v572_v4 = vld [vmem:[#allocation5 + $0x8] sm:$0xff]  ;;  %v570_v5 = vld [vmem:[#allocation2 + $0x8] sm:$0xff]  ;;  %vm137_vm2 = vcmask 64512   ;;  %s961_s21 = smov 32  }
  0x38   :  { %798 = vmatprep.subr.mxu1 %v958_v0  ;;  %800 = vmatprep.mubr.msk.f32.mxu1 %vm959_vm0, %v958_v0  ;;  %v57_v3 = vmul.f32 0.17677669, %v56_v2  ;;  %v571_v6 = vmul.f32 0.17677669, %v570_v5  ;;  %v59_v10 = vld [vmem:[#allocation7] sm:$0xff]  ;;  %v573_v30 = vld [vmem:[#allocation7 + $0x8] sm:$0xff] }
  0x39   :  { %794 = vmatpush3.xpose.msk.msra.mxu0 %vm60_vm1, %v58_v1  ;;  %799 = vmatpush3.msra.mxu1 %v59_v10  ;;  %vm399_vm3 = vcmask 523520   ;;  %s962_s22 = smov [#allocation8]  }
  0x3a   :  { %808 = vmatprep.subr.mxu0 %v958_v0  ;;  %228 = vrot.lane.b32.xlu1 %v57_v3, %s960_s2  ;;  %s752_s23 = sshll.u32 %s962_s22, 4  ;;  %s753_s23 = int_to_ptr.vmem [resolvable:$true] %s752_s23 }
  0x3b   :  { %803 = vmatprep.subr.mxu1 %v958_v0  ;;  %s925_s26 = scalar_lea.vmem %s753_s23, 256  ;;  %p930_p11 = scmp.lt.s32.totalorder %s753_s23, %s753_s23 }
  0x3c   :  { %796 = vmatmul.mubr.msk.f32.vlgmr.msra.gmra.mrb[0].mxu0 %vm60_vm1, %v57_v3  ;;  %p926_p10 = scmp.ne.s32.totalorder %s753_s23, %s925_s26  ;;  %p931_p12 = scmp.lt.s32.totalorder %s925_s26, %s925_s26 }
  0x3d   :  { %810 = vmatprep.mubr.msk.f32.mxu0 %vm959_vm0, %v958_v0 }
  0x3e   :  { %578 = vrot.lane.b32.xlu1 %v572_v4, %s960_s2  ;;  %p932_p13 = por %p931_p12, %p930_p11 }
  0x40   :  { %p933_p0 = pnand %p932_p13, %p926_p10 }
  0x42   :  { %575 = vrot.lane.b32.xlu1 %v571_v6, %s960_s2 }
  0xac   :  { %v229_v14 = vpop.permute.xlu1 %228 }
  0xb0   :  { %v579_v17 = vpop.permute.xlu1 %578 }
  0xb4   :  { %v576_v18 = vpop.permute.xlu1 %575 }
 0x10f   :  { %v133_v7 = vpop.f32.mrb[0].mxu0 }
 0x110   :  { %v797_v8 = vpop.f32.mrb[1].mxu0  ;;  %v138_v9 = vsel %vm137_vm2, %v133_v7, -inf }
 0x111   :  { %139 = vmax.xlane.f32.xlu0 %v138_v9 }
 0x127   :  { %231 = vrot.lane.b32.xlu0 %v58_v1, %s960_s2 }
 0x19e   :  { %v140_v11 = vpop.xlane.xlu0 %139 }
 0x19f   :  { %v141_v12 = vsub.f32 %v133_v7, %v140_v11 }
 0x1a1   :  { %v142_v13 = vmul.f32 1.442695, %v141_v12 }
 0x1a2   :  { %v232_v15 = vpop.permute.xlu0 %231 }
 0x1a3   :  { %843 = vpow2.f32 %v142_v13 }
 0x1ad   :  { %v844_v16 = vpop.eup %843 }
 0x1ae   :  { %801 = vmatmul.mubr.msk.f32.vlgmr.msra.gmra.mrb[0].mxu1 %vm137_vm2, %v844_v16  ;;  %v144_v45 = vsel %vm137_vm2, %v844_v16, 0.0 }
 0x1af   :  { %804 = vmatpush3.xpose.msk.msra.mxu1 %vm60_vm1, %v232_v15  ;;  %805 = vmatprep.mubr.msk.f32.mxu1 %vm959_vm0, %v958_v0 }
 0x1b0   :  { %813 = vmatprep.subr.mxu1 %v958_v0 }
 0x1b2   :  { %806 = vmatmul.mubr.msk.f32.vlgmr.msra.gmra.mrb[2].mxu1 %vm60_vm1, %v229_v14 }
 0x1b3   :  { %814 = vmatpush3.xpose.msk.msra.mxu1 %vm60_vm1, %v572_v4  ;;  %815 = vmatprep.mubr.msk.f32.mxu1 %vm959_vm0, %v958_v0 }
 0x1b4   :  { %823 = vmatprep.subr.mxu1 %v958_v0 }
 0x1b6   :  { %816 = vmatmul.mubr.msk.f32.vlgmr.msra.gmra.mrb[4].mxu1 %vm60_vm1, %v571_v6 }
 0x1b7   :  { %824 = vmatpush3.xpose.msk.msra.mxu1 %vm60_vm1, %v579_v17  ;;  %825 = vmatprep.mubr.msk.f32.mxu1 %vm959_vm0, %v958_v0 }
 0x1ba   :  { %826 = vmatmul.mubr.msk.f32.vlgmr.msra.gmra.mrb[6].mxu1 %vm60_vm1, %v576_v18 }
 0x281   :  { %v216_v19 = vpop.f32.mrb[0].mxu1 }
 0x282   :  { %v802_v20 = vpop.f32.mrb[1].mxu1 }
 0x285   :  { %v303_v21 = vpop.f32.mrb[2].mxu1 }
 0x286   :  { %v807_v22 = vpop.f32.mrb[3].mxu1  ;;  %v307_v23 = vsel %vm137_vm2, %v303_v21, -inf }
 0x287   :  { %308 = vmax.xlane.f32.xlu1 %v307_v23 }
 0x289   :  { %v480_v24 = vpop.f32.mrb[4].mxu1 }
 0x28a   :  { %v817_v25 = vpop.f32.mrb[5].mxu1  ;;  %v484_v26 = vsel %vm137_vm2, %v480_v24, -inf }
 0x28b   :  { %485 = vmax.xlane.f32.xlu0 %v484_v26 }
 0x28d   :  { %v650_v27 = vpop.f32.mrb[6].mxu1 }
 0x28e   :  { %v827_v28 = vpop.f32.mrb[7].mxu1  ;;  %v654_v29 = vsel %vm137_vm2, %v650_v27, -inf }
 0x28f   :  { %655 = vmax.xlane.f32.xlu1 %v654_v29 }
 0x2a0   :  { %317 = vrot.lane.b32.xlu1 %v59_v10, %s960_s2 }
 0x2a1   :  { %664 = vrot.lane.b32.xlu0 %v573_v30, %s960_s2 }
 0x314   :  { %v309_v31 = vpop.xlane.xlu1 %308 }
 0x315   :  { %v310_v32 = vsub.f32 %v303_v21, %v309_v31 }
 0x317   :  { %v311_v33 = vmul.f32 1.442695, %v310_v32 }
 0x318   :  { %v486_v34 = vpop.xlane.xlu0 %485 }
 0x319   :  { %845 = vpow2.f32 %v311_v33  ;;  %v487_v35 = vsub.f32 %v480_v24, %v486_v34 }
 0x31b   :  { %v488_v36 = vmul.f32 1.442695, %v487_v35 }
 0x31c   :  { %v656_v37 = vpop.xlane.xlu1 %655  ;;  %v665_v43 = vpop.permute.xlu0 %664 }
 0x31d   :  { %847 = vpow2.f32 %v488_v36  ;;  %v657_v38 = vsub.f32 %v650_v27, %v656_v37 }
 0x31f   :  { %v658_v39 = vmul.f32 1.442695, %v657_v38 }
 0x320   :  { %v318_v40 = vpop.permute.xlu1 %317 }
 0x321   :  { %849 = vpow2.f32 %v658_v39  ;;  %809 = vmatpush3.msra.mxu0 %v318_v40 }
 0x322   :  { %818 = vmatprep.subr.mxu0 %v958_v0 }
 0x323   :  { %v846_v41 = vpop.eup %845 }
 0x324   :  { %811 = vmatmul.mubr.msk.f32.vlgmr.msra.gmra.mrb[2].mxu0 %vm137_vm2, %v846_v41  ;;  %v313_v42 = vsel %vm137_vm2, %v846_v41, 0.0 }
 0x325   :  { %314 = vadd.xlane.f32.xlu1 %v313_v42  ;;  %819 = vmatpush3.msra.mxu0 %v573_v30 }
 0x326   :  { %820 = vmatprep.mubr.msk.f32.mxu0 %vm959_vm0, %v958_v0  ;;  %828 = vmatprep.subr.mxu0 %v958_v0 }
 0x327   :  { %v848_v44 = vpop.eup %847 }
 0x328   :  { %821 = vmatmul.mubr.msk.f32.vlgmr.msra.gmra.mrb[4].mxu0 %vm137_vm2, %v848_v44  ;;  %v490_v47 = vsel %vm137_vm2, %v848_v44, 0.0 }
 0x329   :  { %145 = vadd.xlane.f32.xlu1 %v144_v45  ;;  %829 = vmatpush3.msra.mxu0 %v665_v43 }
 0x32a   :  { %830 = vmatprep.mubr.msk.f32.mxu0 %vm959_vm0, %v958_v0 }
 0x32b   :  { %v850_v46 = vpop.eup %849 }
 0x32c   :  { %831 = vmatmul.mubr.msk.f32.vlgmr.msra.gmra.mrb[6].mxu0 %vm137_vm2, %v850_v46  ;;  %v660_v48 = vsel %vm137_vm2, %v850_v46, 0.0 }
 0x32d   :  { %491 = vadd.xlane.f32.xlu1 %v490_v47  ;;  %661 = vadd.xlane.f32.xlu0 %v660_v48 }
 0x3b2   :  { %v315_v49 = vpop.xlane.xlu1 %314 }
 0x3b6   :  { %v146_v50 = vpop.xlane.xlu1 %145 }
 0x3b7   :  { %851 = vrcp.f32 %v146_v50 }
 0x3b8   :  { %853 = vrcp.f32 %v315_v49 }
 0x3ba   :  { %v492_v53 = vpop.xlane.xlu1 %491  ;;  %v662_v54 = vpop.xlane.xlu0 %661 }
 0x3bb   :  { %855 = vrcp.f32 %v492_v53 }
 0x3bc   :  { %857 = vrcp.f32 %v662_v54 }
 0x3c1   :  { %v852_v51 = vpop.eup %851 }
 0x3c2   :  { %v221_v52 = vmul.f32 %v852_v51, %v216_v19  ;;  %v854_v55 = vpop.eup %853 }
 0x3c4   :  { %222 = vst.msk [vmem:[#allocation8] sm:$0xff] %vm60_vm1, %v221_v52 }
 0x3c5   :  { %v856_v59 = vpop.eup %855 }
 0x3c6   :  { %v858_v63 = vpop.eup %857 }
 0x3f7   :  { %v389_v56 = vpop.f32.mrb[2].mxu0 }
 0x3f8   :  { %v394_v57 = vmul.f32 %v854_v55, %v389_v56  ;;  %v812_v58 = vpop.f32.mrb[3].mxu0 }
 0x3fa   :  { %396 = vrot.lane.b32.xlu0 %v394_v57, %s961_s21 }
 0x3fb   :  { %v562_v60 = vpop.f32.mrb[4].mxu0 }
 0x3fc   :  { %v567_v61 = vmul.f32 %v856_v59, %v562_v60  ;;  %v822_v62 = vpop.f32.mrb[5].mxu0 }
 0x3fe   :  { %569 = vst.msk [vmem:[#allocation8 + $0x8] sm:$0xff] %vm60_vm1, %v567_v61 }
 0x3ff   :  { %v736_v0 = vpop.f32.mrb[6].mxu0 }
 0x400   :  { %v741_v1 = vmul.f32 %v858_v63, %v736_v0  ;;  %v832_v2 = vpop.f32.mrb[7].mxu0 }
 0x402   :  { %743 = vrot.lane.b32.xlu1 %v741_v1, %s961_s21 }
 0x46c   :  { %v397_v3 = vpop.permute.xlu0 %396 }
 0x46d   :  { %400 = vst.msk [vmem:[#allocation8] sm:$0xff] %vm399_vm3, %v397_v3 }
 0x474   :  { %v744_v4 = vpop.permute.xlu1 %743 }
 0x475   :  { %746 = vst.msk [vmem:[#allocation8 + $0x8] sm:$0xff] %vm399_vm3, %v744_v4 }
 0x476   :  { %936 = shalt.err (!%p933_p0)
}
 0x477   :  { %s937_s29 = scalar_lea.hbm %s1105_s3, 256 }
 0x478   :  { %p938_p1 = scmp.ne.s32.totalorder %s1105_s3, %s937_s29  ;;  %p941_p2 = scmp.lt.u32.totalorder %s937_s29, %s1105_s3 }
 0x47a   :  { %p943_p3 = pnand %p941_p2, %p938_p1 }
 0x47c   :  { %946 = shalt.err (!%p943_p3)
}
 0x47d   :  { %758 = dma.vmem_to_hbm [thread:$0]  %s753_s23, 256, %s1105_s3, [#allocation4], %s955_s24, %s955_s24, %s956_s25  }
 0x47e   :  { %951 = dma.done.wait [#allocation4], 256  }
 0x47f   :  { %952 = vsyncadd [#allocation4], 4294967040 }
 0x480   :  { %762 = vsyncpa [#allocation3], 1 }
 0x481   :  { %763 = vsyncpa [#allocation6], 1 }
 0x482   :  { %764 = vsyncpa [#allocation4], 1 }

// kernel: tpu_custom_call.1
= control target key start
LH: loop header
LB: loop body
LE: loop exit
PB: predicated region body
PF: predicated region fallthrough
CT: control target
= control target key end

     0   :  { %8 = vsyncpa [#allocation3], 0  ;;  %s1102_s0 = inlined_call_operand.hbm [shape: f32[2,8,64], index: 0, kind: input, shape index: {}]   ;;  %s1103_s1 = inlined_call_operand.hbm [shape: f32[2,8,64], index: 1, kind: input, shape index: {}]   ;;  %s1104_s2 = inlined_call_operand.hbm [shape: f32[2,8,64], index: 2, kind: input, shape index: {}]   ;;  %s1105_s3 = inlined_call_operand.hbm [shape: f32[2,8,64], index: 3, kind: output, shape index: {}]  }
   0x1   :  { %9 = vsyncpa [#allocation6], 0 }
   0x2   :  { %10 = vsyncpa [#allocation4], 0  ;;  %s953_s12 = smov [#allocation5]   ;;  %s954_s14 = smov [#allocation2]  }
   0x3   :  { %s28_s13 = sshll.u32 %s953_s12, 4  ;;  %s16_s15 = sshll.u32 %s954_s14, 4  ;;  %s29_s13 = int_to_ptr.vmem [resolvable:$true] %s28_s13  ;;  %s983_s15 = int_to_ptr.vmem [resolvable:$true] %s16_s15 }
   0x4   :  { %s859_s18 = scalar_lea.hbm %s1103_s1, 256 }
   0x5   :  { %p860_p0 = scmp.ne.s32.totalorder %s1103_s1, %s859_s18  ;;  %p863_p1 = scmp.lt.u32.totalorder %s859_s18, %s1103_s1 }
   0x7   :  { %p865_p2 = pnand %p863_p1, %p860_p0 }
   0x9   :  { %868 = shalt.err (!%p865_p2)
}
   0xa   :  { %s869_s23 = scalar_lea.vmem %s29_s13, 256  ;;  %p874_p4 = scmp.lt.s32.totalorder %s29_s13, %s29_s13 }
   0xb   :  { %p870_p3 = scmp.ne.s32.totalorder %s29_s13, %s869_s23  ;;  %p875_p5 = scmp.lt.s32.totalorder %s869_s23, %s869_s23 }
   0xd   :  { %p876_p6 = por %p875_p5, %p874_p4 }
   0xf   :  { %p877_p7 = pnand %p876_p6, %p870_p3 }
  0x11   :  { %880 = shalt.err (!%p877_p7)
}
  0x12   :  { %s955_s24 = smov 128   ;;  %s956_s25 = smov 8  }
  0x13   :  { %34 = dma.hbm_to_vmem [thread:$0]  %s1103_s1, 256, %s29_s13, [#allocation6], %s955_s24, %s955_s24, %s956_s25  }
  0x14   :  { %s881_s30 = scalar_lea.hbm %s1102_s0, 256 }
  0x15   :  { %p882_p8 = scmp.ne.s32.totalorder %s1102_s0, %s881_s30  ;;  %p885_p9 = scmp.lt.u32.totalorder %s881_s30, %s1102_s0 }
  0x17   :  { %p887_p10 = pnand %p885_p9, %p882_p8 }
  0x19   :  { %890 = shalt.err (!%p887_p10)
}
  0x1a   :  { %s891_s8 = scalar_lea.vmem %s983_s15, 256  ;;  %p896_p12 = scmp.lt.s32.totalorder %s983_s15, %s983_s15 }
  0x1b   :  { %p892_p11 = scmp.ne.s32.totalorder %s983_s15, %s891_s8  ;;  %p897_p13 = scmp.lt.s32.totalorder %s891_s8, %s891_s8 }
  0x1d   :  { %p898_p0 = por %p897_p13, %p896_p12 }
  0x1f   :  { %p899_p1 = pnand %p898_p0, %p892_p11 }
  0x21   :  { %902 = shalt.err (!%p899_p1)
}
  0x22   :  { %22 = dma.hbm_to_vmem [thread:$0]  %s1102_s0, 256, %s983_s15, [#allocation3], %s955_s24, %s955_s24, %s956_s25  }
  0x23   :  { %s957_s10 = smov [#allocation7]   ;;  %s903_s14 = scalar_lea.hbm %s1104_s2, 256 }
  0x24   :  { %s40_s11 = sshll.u32 %s957_s10, 4  ;;  %p904_p2 = scmp.ne.s32.totalorder %s1104_s2, %s903_s14  ;;  %s41_s11 = int_to_ptr.vmem [resolvable:$true] %s40_s11 }
  0x25   :  { %p907_p3 = scmp.lt.u32.totalorder %s903_s14, %s1104_s2 }
  0x27   :  { %p909_p4 = pnand %p907_p3, %p904_p2 }
  0x29   :  { %912 = shalt.err (!%p909_p4)
}
  0x2a   :  { %s913_s20 = scalar_lea.vmem %s41_s11, 256  ;;  %p918_p6 = scmp.lt.s32.totalorder %s41_s11, %s41_s11 }
  0x2b   :  { %p914_p5 = scmp.ne.s32.totalorder %s41_s11, %s913_s20  ;;  %p919_p7 = scmp.lt.s32.totalorder %s913_s20, %s913_s20 }
  0x2d   :  { %p920_p8 = por %p919_p7, %p918_p6 }
  0x2f   :  { %p921_p9 = pnand %p920_p8, %p914_p5 }
  0x31   :  { %924 = shalt.err (!%p921_p9)
}
  0x32   :  { %46 = dma.hbm_to_vmem [thread:$0]  %s1104_s2, 256, %s41_s11, [#allocation6], %s955_s24, %s955_s24, %s956_s25  }
  0x33   :  { %947 = dma.done.wait [#allocation3], 256  }
  0x34   :  { %948 = vsyncadd [#allocation3], 4294967040 }
  0x35   :  { %949 = dma.done.wait [#allocation6], 512  }
  0x36   :  { %950 = vsyncadd [#allocation6], 4294966784  ;;  %v958_v0 = vmov 0.0   ;;  %vm959_vm0 = vmmov 0   ;;  %vm60_vm1 = vcmask 261120   ;;  %v58_v1 = vld [vmem:[#allocation5] sm:$0xff] }
  0x37   :  { %793 = vmatprep.subr.mxu0 %v958_v0  ;;  %795 = vmatprep.mubr.msk.f32.mxu0 %vm959_vm0, %v958_v0  ;;  %v56_v2 = vld [vmem:[#allocation2] sm:$0xff]  ;;  %s960_s2 = smov 96   ;;  %v572_v4 = vld [vmem:[#allocation5 + $0x8] sm:$0xff]  ;;  %v570_v5 = vld [vmem:[#allocation2 + $0x8] sm:$0xff]  ;;  %vm137_vm2 = vcmask 64512   ;;  %s961_s21 = smov 32  }
  0x38   :  { %798 = vmatprep.subr.mxu1 %v958_v0  ;;  %800 = vmatprep.mubr.msk.f32.mxu1 %vm959_vm0, %v958_v0  ;;  %v57_v3 = vmul.f32 0.17677669, %v56_v2  ;;  %v571_v6 = vmul.f32 0.17677669, %v570_v5  ;;  %v59_v10 = vld [vmem:[#allocation7] sm:$0xff]  ;;  %v573_v30 = vld [vmem:[#allocation7 + $0x8] sm:$0xff] }
  0x39   :  { %794 = vmatpush3.xpose.msk.msra.mxu0 %vm60_vm1, %v58_v1  ;;  %799 = vmatpush3.msra.mxu1 %v59_v10  ;;  %vm399_vm3 = vcmask 523520   ;;  %s962_s22 = smov [#allocation8]  }
  0x3a   :  { %808 = vmatprep.subr.mxu0 %v958_v0  ;;  %228 = vrot.lane.b32.xlu1 %v57_v3, %s960_s2  ;;  %s752_s23 = sshll.u32 %s962_s22, 4  ;;  %s753_s23 = int_to_ptr.vmem [resolvable:$true] %s752_s23 }
  0x3b   :  { %803 = vmatprep.subr.mxu1 %v958_v0  ;;  %s925_s26 = scalar_lea.vmem %s753_s23, 256  ;;  %p930_p11 = scmp.lt.s32.totalorder %s753_s23, %s753_s23 }
  0x3c   :  { %796 = vmatmul.mubr.msk.f32.vlgmr.msra.gmra.mrb[0].mxu0 %vm60_vm1, %v57_v3  ;;  %p926_p10 = scmp.ne.s32.totalorder %s753_s23, %s925_s26  ;;  %p931_p12 = scmp.lt.s32.totalorder %s925_s26, %s925_s26 }
  0x3d   :  { %810 = vmatprep.mubr.msk.f32.mxu0 %vm959_vm0, %v958_v0 }
  0x3e   :  { %578 = vrot.lane.b32.xlu1 %v572_v4, %s960_s2  ;;  %p932_p13 = por %p931_p12, %p930_p11 }
  0x40   :  { %p933_p0 = pnand %p932_p13, %p926_p10 }
  0x42   :  { %575 = vrot.lane.b32.xlu1 %v571_v6, %s960_s2 }
  0xac   :  { %v229_v14 = vpop.permute.xlu1 %228 }
  0xb0   :  { %v579_v17 = vpop.permute.xlu1 %578 }
  0xb4   :  { %v576_v18 = vpop.permute.xlu1 %575 }
 0x10f   :  { %v133_v7 = vpop.f32.mrb[0].mxu0 }
 0x110   :  { %v797_v8 = vpop.f32.mrb[1].mxu0  ;;  %v138_v9 = vsel %vm137_vm2, %v133_v7, -inf }
 0x111   :  { %139 = vmax.xlane.f32.xlu0 %v138_v9 }
 0x127   :  { %231 = vrot.lane.b32.xlu0 %v58_v1, %s960_s2 }
 0x19e   :  { %v140_v11 = vpop.xlane.xlu0 %139 }
 0x19f   :  { %v141_v12 = vsub.f32 %v133_v7, %v140_v11 }
 0x1a1   :  { %v142_v13 = vmul.f32 1.442695, %v141_v12 }
 0x1a2   :  { %v232_v15 = vpop.permute.xlu0 %231 }
 0x1a3   :  { %843 = vpow2.f32 %v142_v13 }
 0x1ad   :  { %v844_v16 = vpop.eup %843 }
 0x1ae   :  { %801 = vmatmul.mubr.msk.f32.vlgmr.msra.gmra.mrb[0].mxu1 %vm137_vm2, %v844_v16  ;;  %v144_v45 = vsel %vm137_vm2, %v844_v16, 0.0 }
 0x1af   :  { %804 = vmatpush3.xpose.msk.msra.mxu1 %vm60_vm1, %v232_v15  ;;  %805 = vmatprep.mubr.msk.f32.mxu1 %vm959_vm0, %v958_v0 }
 0x1b0   :  { %813 = vmatprep.subr.mxu1 %v958_v0 }
 0x1b2   :  { %806 = vmatmul.mubr.msk.f32.vlgmr.msra.gmra.mrb[2].mxu1 %vm60_vm1, %v229_v14 }
 0x1b3   :  { %814 = vmatpush3.xpose.msk.msra.mxu1 %vm60_vm1, %v572_v4  ;;  %815 = vmatprep.mubr.msk.f32.mxu1 %vm959_vm0, %v958_v0 }
 0x1b4   :  { %823 = vmatprep.subr.mxu1 %v958_v0 }
 0x1b6   :  { %816 = vmatmul.mubr.msk.f32.vlgmr.msra.gmra.mrb[4].mxu1 %vm60_vm1, %v571_v6 }
 0x1b7   :  { %824 = vmatpush3.xpose.msk.msra.mxu1 %vm60_vm1, %v579_v17  ;;  %825 = vmatprep.mubr.msk.f32.mxu1 %vm959_vm0, %v958_v0 }
 0x1ba   :  { %826 = vmatmul.mubr.msk.f32.vlgmr.msra.gmra.mrb[6].mxu1 %vm60_vm1, %v576_v18 }
 0x281   :  { %v216_v19 = vpop.f32.mrb[0].mxu1 }
 0x282   :  { %v802_v20 = vpop.f32.mrb[1].mxu1 }
 0x285   :  { %v303_v21 = vpop.f32.mrb[2].mxu1 }
 0x286   :  { %v807_v22 = vpop.f32.mrb[3].mxu1  ;;  %v307_v23 = vsel %vm137_vm2, %v303_v21, -inf }
 0x287   :  { %308 = vmax.xlane.f32.xlu1 %v307_v23 }
 0x289   :  { %v480_v24 = vpop.f32.mrb[4].mxu1 }
 0x28a   :  { %v817_v25 = vpop.f32.mrb[5].mxu1  ;;  %v484_v26 = vsel %vm137_vm2, %v480_v24, -inf }
 0x28b   :  { %485 = vmax.xlane.f32.xlu0 %v484_v26 }
 0x28d   :  { %v650_v27 = vpop.f32.mrb[6].mxu1 }
 0x28e   :  { %v827_v28 = vpop.f32.mrb[7].mxu1  ;;  %v654_v29 = vsel %vm137_vm2, %v650_v27, -inf }
 0x28f   :  { %655 = vmax.xlane.f32.xlu1 %v654_v29 }
 0x2a0   :  { %317 = vrot.lane.b32.xlu1 %v59_v10, %s960_s2 }
 0x2a1   :  { %664 = vrot.lane.b32.xlu0 %v573_v30, %s960_s2 }
 0x314   :  { %v309_v31 = vpop.xlane.xlu1 %308 }
 0x315   :  { %v310_v32 = vsub.f32 %v303_v21, %v309_v31 }
 0x317   :  { %v311_v33 = vmul.f32 1.442695, %v310_v32 }
 0x318   :  { %v486_v34 = vpop.xlane.xlu0 %485 }
 0x319   :  { %845 = vpow2.f32 %v311_v33  ;;  %v487_v35 = vsub.f32 %v480_v24, %v486_v34 }
 0x31b   :  { %v488_v36 = vmul.f32 1.442695, %v487_v35 }
 0x31c   :  { %v656_v37 = vpop.xlane.xlu1 %655  ;;  %v665_v43 = vpop.permute.xlu0 %664 }
 0x31d   :  { %847 = vpow2.f32 %v488_v36  ;;  %v657_v38 = vsub.f32 %v650_v27, %v656_v37 }
 0x31f   :  { %v658_v39 = vmul.f32 1.442695, %v657_v38 }
 0x320   :  { %v318_v40 = vpop.permute.xlu1 %317 }
 0x321   :  { %849 = vpow2.f32 %v658_v39  ;;  %809 = vmatpush3.msra.mxu0 %v318_v40 }
 0x322   :  { %818 = vmatprep.subr.mxu0 %v958_v0 }
 0x323   :  { %v846_v41 = vpop.eup %845 }
 0x324   :  { %811 = vmatmul.mubr.msk.f32.vlgmr.msra.gmra.mrb[2].mxu0 %vm137_vm2, %v846_v41  ;;  %v313_v42 = vsel %vm137_vm2, %v846_v41, 0.0 }
 0x325   :  { %314 = vadd.xlane.f32.xlu1 %v313_v42  ;;  %819 = vmatpush3.msra.mxu0 %v573_v30 }
 0x326   :  { %820 = vmatprep.mubr.msk.f32.mxu0 %vm959_vm0, %v958_v0  ;;  %828 = vmatprep.subr.mxu0 %v958_v0 }
 0x327   :  { %v848_v44 = vpop.eup %847 }
 0x328   :  { %821 = vmatmul.mubr.msk.f32.vlgmr.msra.gmra.mrb[4].mxu0 %vm137_vm2, %v848_v44  ;;  %v490_v47 = vsel %vm137_vm2, %v848_v44, 0.0 }
 0x329   :  { %145 = vadd.xlane.f32.xlu1 %v144_v45  ;;  %829 = vmatpush3.msra.mxu0 %v665_v43 }
 0x32a   :  { %830 = vmatprep.mubr.msk.f32.mxu0 %vm959_vm0, %v958_v0 }
 0x32b   :  { %v850_v46 = vpop.eup %849 }
 0x32c   :  { %831 = vmatmul.mubr.msk.f32.vlgmr.msra.gmra.mrb[6].mxu0 %vm137_vm2, %v850_v46  ;;  %v660_v48 = vsel %vm137_vm2, %v850_v46, 0.0 }
 0x32d   :  { %491 = vadd.xlane.f32.xlu1 %v490_v47  ;;  %661 = vadd.xlane.f32.xlu0 %v660_v48 }
 0x3b2   :  { %v315_v49 = vpop.xlane.xlu1 %314 }
 0x3b6   :  { %v146_v50 = vpop.xlane.xlu1 %145 }
 0x3b7   :  { %851 = vrcp.f32 %v146_v50 }
 0x3b8   :  { %853 = vrcp.f32 %v315_v49 }
 0x3ba   :  { %v492_v53 = vpop.xlane.xlu1 %491  ;;  %v662_v54 = vpop.xlane.xlu0 %661 }
 0x3bb   :  { %855 = vrcp.f32 %v492_v53 }
 0x3bc   :  { %857 = vrcp.f32 %v662_v54 }
 0x3c1   :  { %v852_v51 = vpop.eup %851 }
 0x3c2   :  { %v221_v52 = vmul.f32 %v852_v51, %v216_v19  ;;  %v854_v55 = vpop.eup %853 }
 0x3c4   :  { %222 = vst.msk [vmem:[#allocation8] sm:$0xff] %vm60_vm1, %v221_v52 }
 0x3c5   :  { %v856_v59 = vpop.eup %855 }
 0x3c6   :  { %v858_v63 = vpop.eup %857 }
 0x3f7   :  { %v389_v56 = vpop.f32.mrb[2].mxu0 }
 0x3f8   :  { %v394_v57 = vmul.f32 %v854_v55, %v389_v56  ;;  %v812_v58 = vpop.f32.mrb[3].mxu0 }
 0x3fa   :  { %396 = vrot.lane.b32.xlu0 %v394_v57, %s961_s21 }
 0x3fb   :  { %v562_v60 = vpop.f32.mrb[4].mxu0 }
 0x3fc   :  { %v567_v61 = vmul.f32 %v856_v59, %v562_v60  ;;  %v822_v62 = vpop.f32.mrb[5].mxu0 }
 0x3fe   :  { %569 = vst.msk [vmem:[#allocation8 + $0x8] sm:$0xff] %vm60_vm1, %v567_v61 }
 0x3ff   :  { %v736_v0 = vpop.f32.mrb[6].mxu0 }
 0x400   :  { %v741_v1 = vmul.f32 %v858_v63, %v736_v0  ;;  %v832_v2 = vpop.f32.mrb[7].mxu0 }
 0x402   :  { %743 = vrot.lane.b32.xlu1 %v741_v1, %s961_s21 }
 0x46c   :  { %v397_v3 = vpop.permute.xlu0 %396 }
 0x46d   :  { %400 = vst.msk [vmem:[#allocation8] sm:$0xff] %vm399_vm3, %v397_v3 }
 0x474   :  { %v744_v4 = vpop.permute.xlu1 %743 }
 0x475   :  { %746 = vst.msk [vmem:[#allocation8 + $0x8] sm:$0xff] %vm399_vm3, %v744_v4 }
 0x476   :  { %936 = shalt.err (!%p933_p0)
}
 0x477   :  { %s937_s29 = scalar_lea.hbm %s1105_s3, 256 }
 0x478   :  { %p938_p1 = scmp.ne.s32.totalorder %s1105_s3, %s937_s29  ;;  %p941_p2 = scmp.lt.u32.totalorder %s937_s29, %s1105_s3 }
 0x47a   :  { %p943_p3 = pnand %p941_p2, %p938_p1 }
 0x47c   :  { %946 = shalt.err (!%p943_p3)
}
 0x47d   :  { %758 = dma.vmem_to_hbm [thread:$0]  %s753_s23, 256, %s1105_s3, [#allocation4], %s955_s24, %s955_s24, %s956_s25  }
 0x47e   :  { %951 = dma.done.wait [#allocation4], 256  }
 0x47f   :  { %952 = vsyncadd [#allocation4], 4294967040 }
 0x480   :  { %762 = vsyncpa [#allocation3], 1 }
 0x481   :  { %763 = vsyncpa [#allocation6], 1 }
 0x482   :  { %764 = vsyncpa [#allocation4], 1 }

</bundles_post_ra>
